<compile_context>
chip_gen: v5e
topology: v5e:2x2
jax: 0.10.0
libtpu: 0.0.40
codegen_flags: <defaults>
</compile_context>

<pallas_src>
import functools
import math

import jax
import jax.numpy as jnp
from jax.experimental import pallas as pl
from jax.experimental.pallas import tpu as pltpu


_DEFAULT_TILE_ELEMS = 1 << 18     # ~256K elements (~1 MiB f32) per input per grid step
_SMALL_N_THRESHOLD = 1 << 16      # below this many keypoints a fused-XLA reduce wins on overhead


def _cdiv(a, b):
    return -(-a // b)


def _round_up(a, b):
    return _cdiv(a, b) * b


def _choose_tiles(B, KC, C, target_elems):
    """Pick a (rows, lanes) block: rows % 8 == 0, lanes % 128 == 0, and lanes % C == 0
    whenever more than one lane-block is needed (so the channel pattern is identical
    in every block and visibility-rolls never straddle a block boundary)."""
    lane_quant = 128 * C // math.gcd(128, C)              # lcm(128, C)
    if KC <= max(target_elems // 8, 128):
        tile_l = _round_up(KC, 128)                        # single lane-block
    else:
        max_lane_tiles = max(1, target_elems // (8 * lane_quant))
        tile_l = min(_cdiv(KC, lane_quant), max_lane_tiles) * lane_quant
    rows_budget = max(8, (target_elems // tile_l) // 8 * 8)
    tile_b = min(_round_up(B, 8), rows_budget)
    return tile_b, tile_l


def _kp_loss_kernel(p_ref, t_ref, out_ref, acc_ref, *, C, use_vis, B, KC,
                    tile_b, tile_l):
    i = pl.program_id(0)          # row-block (parallel axis)
    j = pl.program_id(1)          # lane-block (reduction axis)

    @pl.when(j == 0)
    def _init():
        acc_ref[...] = jnp.zeros_like(acc_ref)

    p = p_ref[...].astype(jnp.float32)
    t = t_ref[...].astype(jnp.float32)
    d = p - t
    sq = d * d                                              # elementwise squared error

    lane = jax.lax.broadcasted_iota(jnp.int32, (1, tile_l), 1)
    chan = lane % C                                         # 0:x, 1:y, 2:visibility, >=3: ignored
    lane_f = lane.astype(jnp.float32)

    if use_vis:
        # Align target visibility (channel 2) onto the x / y lanes with lane rolls.
        # Both roll directions are produced and the right one is picked per lane
        # via the rolled lane index, so the result is independent of the roll
        # shift-sign convention.  Wrap-around only lands on lanes that never
        # consume the rolled value (masked / non-coordinate channels).
        def _vis_on(dist):
            t_a = pltpu.roll(t, tile_l - dist, axis=1)
            t_b = pltpu.roll(t, dist, axis=1)
            la = pltpu.roll(lane_f, tile_l - dist, axis=1)
            take_a = la == (lane_f + float(dist))           # True where roll A fetched lane+dist
            return jnp.where(take_a, t_a, t_b)

        v_on_x = _vis_on(2)
        v_on_y = _vis_on(1)
        # loss = [sum(vis*sq_xy) + 0.2*sum(sq_vis)] / (2*B*K); extra channels get 0.
        base = jnp.where(chan == 2, jnp.float32(0.2), jnp.float32(0.0))
        w = jnp.where(chan == 0, v_on_x, jnp.where(chan == 1, v_on_y, base))
        contrib = sq * w
    else:
        if C > 2:
            contrib = jnp.where(chan < 2, sq, jnp.float32(0.0))
        else:
            contrib = sq

    # Zero out-of-range rows / lanes of edge blocks (blocks are quantized to
    # (8k, 128m) and inputs are never padded in HBM, so edge buffers hold garbage).
    valid = None
    if KC % tile_l != 0:
        valid = (j * tile_l + lane) < KC
    if B % tile_b != 0:
        row = jax.lax.broadcasted_iota(jnp.int32, (tile_b, 1), 0)
        row_ok = (i * tile_b + row) < B
        valid = row_ok if valid is None else (valid & row_ok)
    if valid is not None:
        contrib = jnp.where(valid, contrib, jnp.float32(0.0))

    # Hot-path accumulation: a single block-wide add (full ILP, no serial
    # (1,128) chain).  The cross-lane reduce runs once per row-block.
    acc_ref[...] += contrib

    @pl.when(j == pl.num_programs(1) - 1)
    def _finalize():
        out_ref[...] = jnp.broadcast_to(jnp.sum(acc_ref[...]), out_ref.shape)


@functools.partial(jax.jit, static_argnames=("use_vis", "tile_elems"))
def _keypoint_loss_pallas(pred, target, use_vis, tile_elems):
    B, K, C = pred.shape
    KC = K * C
    N = B * K

    # Free, layout-preserving views: no transpose / concat / pad staging pass.
    p2 = pred.reshape(B, KC)
    t2 = target.reshape(B, KC)

    tile_b, tile_l = _choose_tiles(B, KC, C, max(int(tile_elems), 1024))
    gb = _cdiv(B, tile_b)
    gl = _cdiv(KC, tile_l)

    kernel = functools.partial(
        _kp_loss_kernel, C=C, use_vis=use_vis, B=B, KC=KC,
        tile_b=tile_b, tile_l=tile_l)

    partials = pl.pallas_call(
        kernel,
        out_shape=jax.ShapeDtypeStruct((gb, 1, 1), jnp.float32),
        grid_spec=pltpu.PrefetchScalarGridSpec(
            num_scalar_prefetch=0,
            grid=(gb, gl),
            in_specs=[pl.BlockSpec((tile_b, tile_l), lambda i, j: (i, j)),
                      pl.BlockSpec((tile_b, tile_l), lambda i, j: (i, j))],
            out_specs=pl.BlockSpec((1, 1, 1), lambda i, j: (i, 0, 0)),
            scratch_shapes=[pltpu.VMEM((tile_b, tile_l), jnp.float32)],
        ),
        # "parallel" row axis shards across TensorCores on 2-TC chips and is a
        # harmless sequential pass on 1-TC chips.
        compiler_params=pltpu.CompilerParams(
            dimension_semantics=("parallel", "arbitrary"),
            vmem_limit_bytes=32 * 1024 * 1024),
    )(p2, t2)

    # Fused means: loss = (sum(vis*sq_xy) + 0.2*sum(sq_vis)) / (2*N)  (or sum(sq_xy)/(2N)).
    return jnp.sum(partials) * jnp.float32(1.0 / (2.0 * N))


def _reference_loss(pred, target, use_visibility=True):
    """Pure-JAX reference mirroring the PyTorch forward."""
    coord_loss = (pred[:, :, :2] - target[:, :, :2]) ** 2
    if use_visibility and pred.shape[2] > 2 and target.shape[2] > 2:
        visibility = target[:, :, 2:3]
        coord_loss = coord_loss * visibility
        vis_loss = (pred[:, :, 2:3] - target[:, :, 2:3]) ** 2
        return coord_loss.mean() + 0.1 * vis_loss.mean()
    return coord_loss.mean()


_reference_loss_jit = jax.jit(_reference_loss, static_argnames=("use_visibility",))


def keypoint_loss(pred, target, use_visibility=True, *, force_pallas=False,
                  tile_elems=_DEFAULT_TILE_ELEMS):
    """pred, target: [B, K, C] (C==3: x, y, visibility). Returns a scalar f32 loss."""
    assert pred.ndim == 3 and pred.shape == target.shape
    B, K, C = pred.shape
    assert C >= 2
    use_vis = bool(use_visibility) and C > 2
    N = B * K
    if not force_pallas and N < _SMALL_N_THRESHOLD:
        # Small-N fast path: fused-XLA elementwise+reduce beats pallas_call
        # launch overhead at these sizes (both paths now read the data once).
        return _reference_loss_jit(pred, target, use_visibility=use_vis)
    return _keypoint_loss_pallas(pred, target, use_vis=use_vis,
                                 tile_elems=int(tile_elems))


if __name__ == "__main__":
    key = jax.random.PRNGKey(0)
    ks = jax.random.split(key, 8)

    # Small shapes consistent with the module: [batch, num_keypoints, 3].
    B, K, C = 2, 8, 3
    pred = jax.random.normal(ks[0], (B, K, C), dtype=jnp.float32)
    tgt_xy = jax.random.normal(ks[1], (B, K, 2), dtype=jnp.float32)
    tgt_v = (jax.random.uniform(ks[2], (B, K, 1)) > 0.3).astype(jnp.float32)
    target = jnp.concatenate([tgt_xy, tgt_v], axis=-1)

    # Visibility path (forced so the kernel itself is exercised at tiny N).
    out = jax.block_until_ready(keypoint_loss(pred, target, True, force_pallas=True))
    ref = _reference_loss(pred, target, True)
    assert jnp.allclose(out, ref, rtol=1e-5, atol=1e-6), (out, ref)

    # No-visibility path.
    out_nv = jax.block_until_ready(keypoint_loss(pred, target, False, force_pallas=True))
    ref_nv = _reference_loss(pred, target, False)
    assert jnp.allclose(out_nv, ref_nv, rtol=1e-5, atol=1e-6), (out_nv, ref_nv)

    # Multi-block grid with row + lane edge masking and cross-block accumulation
    # (small tile_elems forces a (6, 3) grid with partial edge blocks).
    B2, K2 = 42, 700
    pred2 = jax.random.normal(ks[3], (B2, K2, C), dtype=jnp.float32)
    t2_xy = jax.random.normal(ks[4], (B2, K2, 2), dtype=jnp.float32)
    t2_v = (jax.random.uniform(ks[5], (B2, K2, 1)) > 0.3).astype(jnp.float32)
    target2 = jnp.concatenate([t2_xy, t2_v], axis=-1)
    out2 = jax.block_until_ready(
        keypoint_loss(pred2, target2, True, force_pallas=True, tile_elems=8192))
    ref2 = _reference_loss(pred2, target2, True)
    assert jnp.allclose(out2, ref2, rtol=1e-4, atol=1e-6), (out2, ref2)

    # Larger single-block case (B=4, K=1500) at the default tile size.
    B3, K3 = 4, 1500
    pred3 = jax.random.normal(ks[6], (B3, K3, C), dtype=jnp.float32)
    t3_xy = jax.random.normal(ks[7], (B3, K3, 2), dtype=jnp.float32)
    t3_v = (jax.random.uniform(ks[2], (B3, K3, 1)) > 0.5).astype(jnp.float32)
    target3 = jnp.concatenate([t3_xy, t3_v], axis=-1)
    out3 = jax.block_until_ready(keypoint_loss(pred3, target3, True, force_pallas=True))
    ref3 = _reference_loss(pred3, target3, True)
    assert jnp.allclose(out3, ref3, rtol=1e-4, atol=1e-6), (out3, ref3)

    # Default dispatch at tiny N takes the fused-XLA fast path.
    _ = jax.block_until_ready(keypoint_loss(pred, target, True))

    print("KERNEL_OK")
</pallas_src>

<mosaic_0001>
module attributes {stable_mosaic.version = 11 : i64} {
  func.func @_kp_loss_kernel(%arg0: i32, %arg1: i32, %arg2: memref<8x128xf32, #tpu.memory_space<vmem>>, %arg3: memref<8x128xf32, #tpu.memory_space<vmem>>, %arg4: memref<1x1x1xf32, #tpu.memory_space<vmem>>, %arg5: memref<8x128xf32, #tpu.memory_space<vmem>>) attributes {dimension_semantics = [#tpu.dimension_semantics<parallel>, #tpu.dimension_semantics<arbitrary>], iteration_bounds = array<i64: 1, 1>, scalar_prefetch = 0 : i64, scratch_operands = 1 : i64, tpu.core_type = #tpu.core_type<tc>, window_params = [{transform_indices = @transform_0, window_bounds = array<i64: 8, 128>}, {transform_indices = @transform_1, window_bounds = array<i64: 8, 128>}, {transform_indices = @transform_2, window_bounds = array<i64: 1, 1, 1>}]} {
    %c0_i32 = arith.constant 0 : i32
    %0 = arith.cmpi eq, %arg1, %c0_i32 : i32
    %1 = arith.extui %0 : i1 to i32
    %c0_i32_0 = arith.constant 0 : i32
    %2 = arith.cmpi ne, %1, %c0_i32_0 : i32
    scf.if %2 {
      %cst_25 = arith.constant 0.000000e+00 : f32
      %83 = vector.broadcast %cst_25 : f32 to vector<8x128xf32>
      %c0_26 = arith.constant 0 : index
      %c0_27 = arith.constant 0 : index
      %84 = vector.load %arg5[%c0_26, %c0_27] : memref<8x128xf32, #tpu.memory_space<vmem>>, vector<8x128xf32>
      tpu.vector_store %arg5[%c0_26, %c0_27], %83 {strides = array<i32>} : memref<8x128xf32, #tpu.memory_space<vmem>>, vector<8x128xf32>,
    } else {
    }
    %c0 = arith.constant 0 : index
    %c0_1 = arith.constant 0 : index
    %3 = vector.load %arg2[%c0, %c0_1] : memref<8x128xf32, #tpu.memory_space<vmem>>, vector<8x128xf32>
    %c0_2 = arith.constant 0 : index
    %c0_3 = arith.constant 0 : index
    %4 = vector.load %arg3[%c0_2, %c0_3] : memref<8x128xf32, #tpu.memory_space<vmem>>, vector<8x128xf32>
    %5 = arith.subf %3, %4 : vector<8x128xf32>
    %6 = arith.mulf %5, %5 : vector<8x128xf32>
    %7 = tpu.iota {dimensions = array<i32: 1>} : vector<1x128xi32>
    %c3_i32 = arith.constant 3 : i32
    %c0_i32_4 = arith.constant 0 : i32
    %8 = arith.cmpi eq, %c3_i32, %c0_i32_4 : i32
    %c1_i32 = arith.constant 1 : i32
    %9 = arith.select %8, %c1_i32, %c3_i32 : i32
    %10 = vector.broadcast %9 : i32 to vector<1x128xi32>
    %11 = arith.remsi %7, %10 : vector<1x128xi32>
    %c0_i32_5 = arith.constant 0 : i32
    %12 = vector.broadcast %c0_i32_5 : i32 to vector<1x128xi32>
    %13 = arith.cmpi ne, %11, %12 : vector<1x128xi32>
    %c0_i32_6 = arith.constant 0 : i32
    %14 = vector.broadcast %c0_i32_6 : i32 to vector<1x128xi32>
    %15 = arith.cmpi slt, %11, %14 : vector<1x128xi32>
    %c0_i32_7 = arith.constant 0 : i32
    %16 = arith.cmpi slt, %9, %c0_i32_7 : i32
    %17 = vector.broadcast %16 : i1 to vector<1x128xi1>
    %18 = vector.broadcast %17 : vector<1x128xi1> to vector<1x128xi1>
    %19 = arith.xori %15, %18 : vector<1x128xi1>
    %20 = arith.andi %19, %13 : vector<1x128xi1>
    %21 = vector.broadcast %9 : i32 to vector<1x128xi32>
    %22 = arith.addi %11, %21 : vector<1x128xi32>
    %23 = arith.select %20, %22, %11 : vector<1x128xi1>, vector<1x128xi32>
    %24 = arith.sitofp %7 : vector<1x128xi32> to vector<1x128xf32>
    %c126_i32 = arith.constant 126 : i32
    %25 = tpu.dynamic_rotate %4 by %c126_i32 dim 1 : vector<8x128xf32>, i32 -> vector<8x128xf32>
    %c2_i32 = arith.constant 2 : i32
    %26 = tpu.dynamic_rotate %4 by %c2_i32 dim 1 : vector<8x128xf32>, i32 -> vector<8x128xf32>
    %c126_i32_8 = arith.constant 126 : i32
    %27 = tpu.dynamic_rotate %24 by %c126_i32_8 dim 1 : vector<1x128xf32>, i32 -> vector<1x128xf32>
    %cst = arith.constant 2.000000e+00 : f32
    %28 = vector.broadcast %cst : f32 to vector<1x128xf32>
    %29 = arith.addf %24, %28 : vector<1x128xf32>
    %30 = arith.cmpf oeq, %27, %29 : vector<1x128xf32>
    %31 = vector.shape_cast %30 : vector<1x128xi1> to vector<1x128xi1>
    %32 = vector.broadcast %31 : vector<1x128xi1> to vector<8x128xi1>
    %33 = arith.select %32, %25, %26 : vector<8x128xi1>, vector<8x128xf32>
    %c127_i32 = arith.constant 127 : i32
    %34 = tpu.dynamic_rotate %4 by %c127_i32 dim 1 : vector<8x128xf32>, i32 -> vector<8x128xf32>
    %c1_i32_9 = arith.constant 1 : i32
    %35 = tpu.dynamic_rotate %4 by %c1_i32_9 dim 1 : vector<8x128xf32>, i32 -> vector<8x128xf32>
    %c127_i32_10 = arith.constant 127 : i32
    %36 = tpu.dynamic_rotate %24 by %c127_i32_10 dim 1 : vector<1x128xf32>, i32 -> vector<1x128xf32>
    %cst_11 = arith.constant 1.000000e+00 : f32
    %37 = vector.broadcast %cst_11 : f32 to vector<1x128xf32>
    %38 = arith.addf %24, %37 : vector<1x128xf32>
    %39 = arith.cmpf oeq, %36, %38 : vector<1x128xf32>
    %40 = vector.shape_cast %39 : vector<1x128xi1> to vector<1x128xi1>
    %41 = vector.broadcast %40 : vector<1x128xi1> to vector<8x128xi1>
    %42 = arith.select %41, %34, %35 : vector<8x128xi1>, vector<8x128xf32>
    %c2_i32_12 = arith.constant 2 : i32
    %43 = vector.broadcast %c2_i32_12 : i32 to vector<1x128xi32>
    %44 = arith.cmpi eq, %23, %43 : vector<1x128xi32>
    %cst_13 = arith.constant 2.000000e-01 : f32
    %cst_14 = arith.constant 0.000000e+00 : f32
    %45 = vector.broadcast %cst_13 : f32 to vector<1x128xf32>
    %46 = vector.broadcast %cst_14 : f32 to vector<1x128xf32>
    %47 = arith.select %44, %45, %46 : vector<1x128xi1>, vector<1x128xf32>
    %c0_i32_15 = arith.constant 0 : i32
    %48 = vector.broadcast %c0_i32_15 : i32 to vector<1x128xi32>
    %49 = arith.cmpi eq, %23, %48 : vector<1x128xi32>
    %c1_i32_16 = arith.constant 1 : i32
    %50 = vector.broadcast %c1_i32_16 : i32 to vector<1x128xi32>
    %51 = arith.cmpi eq, %23, %50 : vector<1x128xi32>
    %52 = vector.shape_cast %51 : vector<1x128xi1> to vector<1x128xi1>
    %53 = vector.broadcast %52 : vector<1x128xi1> to vector<8x128xi1>
    %54 = vector.shape_cast %47 : vector<1x128xf32> to vector<1x128xf32>
    %55 = vector.broadcast %54 : vector<1x128xf32> to vector<8x128xf32>
    %56 = arith.select %53, %42, %55 : vector<8x128xi1>, vector<8x128xf32>
    %57 = vector.shape_cast %49 : vector<1x128xi1> to vector<1x128xi1>
    %58 = vector.broadcast %57 : vector<1x128xi1> to vector<8x128xi1>
    %59 = arith.select %58, %33, %56 : vector<8x128xi1>, vector<8x128xf32>
    %60 = arith.mulf %6, %59 : vector<8x128xf32>
    %c128_i32 = arith.constant 128 : i32
    %61 = arith.muli %arg1, %c128_i32 : i32
    %62 = vector.broadcast %61 : i32 to vector<1x128xi32>
    %63 = arith.addi %62, %7 : vector<1x128xi32>
    %c24_i32 = arith.constant 24 : i32
    %64 = vector.broadcast %c24_i32 : i32 to vector<1x128xi32>
    %65 = arith.cmpi slt, %63, %64 : vector<1x128xi32>
    %66 = tpu.iota {dimensions = array<i32: 0>} : vector<8x1xi32>
    %c8_i32 = arith.constant 8 : i32
    %67 = arith.muli %arg0, %c8_i32 : i32
    %68 = vector.broadcast %67 : i32 to vector<8x1xi32>
    %69 = arith.addi %68, %66 : vector<8x1xi32>
    %c2_i32_17 = arith.constant 2 : i32
    %70 = vector.broadcast %c2_i32_17 : i32 to vector<8x1xi32>
    %71 = arith.cmpi slt, %69, %70 : vector<8x1xi32>
    %72 = vector.broadcast %65 : vector<1x128xi1> to vector<8x128xi1>
    %73 = vector.broadcast %71 : vector<8x1xi1> to vector<8x128xi1>
    %74 = arith.andi %72, %73 : vector<8x128xi1>
    %cst_18 = arith.constant 0.000000e+00 : f32
    %75 = vector.broadcast %cst_18 : f32 to vector<8x128xf32>
    %76 = arith.select %74, %60, %75 : vector<8x128xi1>, vector<8x128xf32>
    %c0_19 = arith.constant 0 : index
    %c0_20 = arith.constant 0 : index
    %77 = vector.load %arg5[%c0_19, %c0_20] : memref<8x128xf32, #tpu.memory_space<vmem>>, vector<8x128xf32>
    %78 = arith.addf %77, %76 : vector<8x128xf32>
    %c0_21 = arith.constant 0 : index
    %c0_22 = arith.constant 0 : index
    %79 = vector.load %arg5[%c0_21, %c0_22] : memref<8x128xf32, #tpu.memory_space<vmem>>, vector<8x128xf32>
    tpu.vector_store %arg5[%c0_21, %c0_22], %78 {strides = array<i32>} : memref<8x128xf32, #tpu.memory_space<vmem>>, vector<8x128xf32>,
    %c0_i32_23 = arith.constant 0 : i32
    %80 = arith.cmpi eq, %arg1, %c0_i32_23 : i32
    %81 = arith.extui %80 : i1 to i32
    %c0_i32_24 = arith.constant 0 : i32
    %82 = arith.cmpi ne, %81, %c0_i32_24 : i32
    scf.if %82 {
      %c0_25 = arith.constant 0 : index
      %c0_26 = arith.constant 0 : index
      %83 = vector.load %arg5[%c0_25, %c0_26] : memref<8x128xf32, #tpu.memory_space<vmem>>, vector<8x128xf32>
      %84 = vector.shape_cast %83 : vector<8x128xf32> to vector<1x8x128xf32>
      %cst_27 = arith.constant dense<0.000000e+00> : vector<1xf32>
      %85 = vector.multi_reduction <add>, %84, %cst_27 [1, 2] : vector<1x8x128xf32> to vector<1xf32>
      %86 = vector.shape_cast %85 : vector<1xf32> to vector<1x1x1xf32>
      %87 = vector.extract %86[0, 0, 0] : f32 from vector<1x1x1xf32>
      %88 = vector.broadcast %87 : f32 to vector<1x1x1xf32>
      %c0_28 = arith.constant 0 : index
      %c0_29 = arith.constant 0 : index
      %c0_30 = arith.constant 0 : index
      %89 = vector.load %arg4[%c0_28, %c0_29, %c0_30] : memref<1x1x1xf32, #tpu.memory_space<vmem>>, vector<1x1x1xf32>
      tpu.vector_store %arg4[%c0_28, %c0_29, %c0_30], %88 {strides = array<i32>} : memref<1x1x1xf32, #tpu.memory_space<vmem>>, vector<1x1x1xf32>,
    } else {
    }
    return
  }
  func.func @transform_0(%arg0: i32, %arg1: i32) -> (i32, i32) {
    %c0_i32 = arith.constant 0 : i32
    return %arg0, %arg1 : i32, i32
  }
  func.func @transform_1(%arg0: i32, %arg1: i32) -> (i32, i32) {
    %c0_i32 = arith.constant 0 : i32
    return %arg0, %arg1 : i32, i32
  }
  func.func @transform_2(%arg0: i32, %arg1: i32) -> (i32, i32, i32) {
    %c0_i32 = arith.constant 0 : i32
    %c0_i32_0 = arith.constant 0 : i32
    %c0_i32_1 = arith.constant 0 : i32
    return %arg0, %c0_i32, %c0_i32_0 : i32, i32, i32
  }
}

</mosaic_0001>

<bundles_post_ra>
// kernel: _keypoint_loss_pallas.1
= control target key start
LH: loop header
LB: loop body
LE: loop exit
PB: predicated region body
PF: predicated region fallthrough
CT: control target
= control target key end

     0   :  { %v21_v1 = vlaneseq  ;;  %s223_s0 = inlined_call_operand.vmem [shape: f32[2,24], index: 0, kind: input, shape index: {}]   ;;  %s224_s1 = inlined_call_operand.vmem [shape: f32[2,24], index: 1, kind: input, shape index: {}]   ;;  %s225_s2 = inlined_call_operand.hbm [shape: f32[1,1,1], index: 2, kind: output, shape index: {}]  }
   0x1   :  { %v18_v0 = vld [vmem:[%s224_s1] sm:$0xff] }
   0x2   :  { %7 = vsyncpa [#allocation4], 0  ;;  %s179_s11 = smov 127   ;;  %v204_v2 = vand.u32 127, %v21_v1  ;;  %s180_s12 = smov 126   ;;  %v183_v13 = vmov 0  }
   0x3   :  { %70 = vrot.lane.b32.xlu1 %v18_v0, %s179_s11  ;;  %58 = vrot.lane.b32.xlu2 %v18_v0, %s180_s12  ;;  %s181_s13 = smov 1   ;;  %s182_s14 = smov 2   ;;  %v17_v34 = vld [vmem:[%s223_s0] sm:$0xff]  ;;  %v98_v39 = vshrl.u32 %v21_v1, 7  ;;  %v184_v41 = vmov 0.0   ;;  %vm126_vm15 = vcmask 0  }
   0x4   :  { %v57_v3 = vcvt.s32.f32 %v204_v2  ;;  %v26_v4 = vand.u32 65535, %v204_v2  ;;  %v27_v5 = vshrl.u32 %v204_v2, 16  ;;  %v19_v38 = vsub.f32 %v17_v34, %v18_v0  ;;  %s185_s0 = smov [#allocation3]   ;;  %s135_s19 = sshll.u32 %s225_s2, 4  ;;  %s136_s19 = int_to_ptr.hbm [resolvable:$true] %s135_s19 }
   0x5   :  { %vm96_vm11 = vcmp.lt.s32.totalorder %v204_v2, 24  ;;  %vm102_vm12 = vcmp.lt.s32.totalorder %v98_v39, 2  ;;  %s133_s16 = sshll.u32 %s185_s0, 4  ;;  %s134_s16 = int_to_ptr.vmem [resolvable:$true] %s133_s16 }
   0x6   :  { %74 = vrot.lane.b32.xlu0 %v57_v3, %s179_s11  ;;  %v30_v6 = vmul.u32 43690, %v26_v4  ;;  %v29_v7 = vmul.u32 43691, %v26_v4  ;;  %v31_v8 = vmul.u32 43691, %v27_v5  ;;  %v32_v12 = vmul.u32 43690, %v27_v5  ;;  %vm107_vm14 = vmand %vm96_vm11, %vm102_vm12 }
   0x7   :  { %v76_v25 = vadd.f32 1.0, %v57_v3  ;;  %v64_v33 = vadd.f32 2.0, %v57_v3  ;;  %v20_v46 = vmul.f32 %v19_v38, %v19_v38 }
   0x8   :  { %v33_v9 = vshll.u32 %v30_v6, 16  ;;  %v35_v10 = vshll.u32 %v31_v8, 16  ;;  %v34_v17 = vshrl.u32 %v30_v6, 16  ;;  %v36_v19 = vshrl.u32 %v31_v8, 16 }
   0xa   :  { %vm37_vm0 = vc.u32 %v29_v7, %v33_v9  ;;  %v39_v11 = vadd.s32 %v33_v9, %v29_v7 }
   0xb   :  { %72 = vrot.lane.b32.xlu1 %v18_v0, %s181_s13  ;;  %60 = vrot.lane.b32.xlu2 %v18_v0, %s182_s14  ;;  %v38_v14 = vsel %vm37_vm0, 1, %v183_v13 }
   0xc   :  { %vm41_vm1 = vc.u32 %v39_v11, %v35_v10  ;;  %v40_v15 = vadd.s32 %v38_v14, %v32_v12 }
   0xd   :  { %v42_v16 = vsel %vm41_vm1, 1, %v183_v13 }
   0xe   :  { %62 = vrot.lane.b32.xlu0 %v57_v3, %s180_s12  ;;  %v44_v18 = vadd.s32 %v42_v16, %v40_v15 }
  0x10   :  { %v45_v20 = vadd.s32 %v44_v18, %v34_v17 }
  0x12   :  { %v46_v21 = vadd.s32 %v45_v20, %v36_v19 }
  0x14   :  { %v47_v22 = vshrl.u32 %v46_v21, 1 }
  0x16   :  { %v48_v23 = vmul.u32 3, %v47_v22 }
  0x18   :  { %v49_v24 = vsub.s32 %v204_v2, %v48_v23 }
  0x1a   :  { %vm52_vm2 = vcmp.ne.s32.totalorder %v49_v24, 0  ;;  %vm53_vm3 = vcmp.lt.s32.totalorder %v49_v24, 0  ;;  %v55_v29 = vadd.s32 3, %v49_v24 }
  0x1b   :  { %vm54_vm5 = vmand %vm53_vm3, %vm52_vm2 }
  0x1c   :  { %v56_v32 = vsel %vm54_vm5, %v55_v29, %v49_v24 }
  0x1d   :  { %vm82_vm7 = vcmp.eq.s32.totalorder %v56_v32, 2  ;;  %vm85_vm9 = vcmp.eq.s32.totalorder %v56_v32, 1  ;;  %vm84_vm10 = vcmp.eq.s32.totalorder %v56_v32, 0 }
  0x1e   :  { %v83_v42 = vsel %vm82_vm7, 0.2, %v184_v41 }
  0x5d   :  { %v59_v28 = vpop.permute.xlu2 %58 }
  0x65   :  { %v61_v45 = vpop.permute.xlu2 %60 }
  0x75   :  { %v71_v26 = vpop.permute.xlu1 %70 }
  0x78   :  { %v75_v27 = vpop.permute.xlu0 %74 }
  0x79   :  { %vm77_vm4 = vcmp.eq.f32.partialorder %v75_v27, %v76_v25 }
  0x7a   :  { %v78_v30 = vsel %vm77_vm4, 1, %v183_v13 }
  0x7b   :  { %v79_v31 = vperm.slane %v78_v30, 0 }
  0x7d   :  { %vm213_vm6 = vcmp.eq.s32.totalorder %v79_v31, 1  ;;  %v73_v36 = vpop.permute.xlu1 %72 }
  0x7e   :  { %v81_v43 = vsel %vm213_vm6, %v71_v26, %v73_v36 }
  0x7f   :  { %v88_v47 = vsel %vm85_vm9, %v81_v43, %v83_v42 }
  0x80   :  { %v63_v37 = vpop.permute.xlu0 %62 }
  0x81   :  { %vm65_vm8 = vcmp.eq.f32.partialorder %v63_v37, %v64_v33 }
  0x82   :  { %v66_v40 = vsel %vm65_vm8, 1, %v183_v13 }
  0x83   :  { %v67_v44 = vperm.slane %v66_v40, 0 }
  0x85   :  { %vm68_vm13 = vcmp.eq.s32.totalorder %v67_v44, 1 }
  0x86   :  { %v69_v48 = vsel %vm68_vm13, %v59_v28, %v61_v45 }
  0x87   :  { %v91_v49 = vsel %vm84_vm10, %v69_v48, %v88_v47 }
  0x88   :  { %v92_v50 = vmul.f32 %v91_v49, %v20_v46 }
  0x8a   :  { %v108_v51 = vsel %vm107_vm14, %v92_v50, 0.0 }
  0x8b   :  { %116 = vadd.xlane.f32.xlu0 %v108_v51 }
  0xfe   :  { %v117_v52 = vpop.xlane.xlu0 %116 }
  0xff   :  { %v118_v53 = vrot.slane %v117_v52, 4 }
 0x101   :  { %v119_v54 = vadd.f32 %v118_v53, %v117_v52 }
 0x103   :  { %v120_v55 = vrot.slane %v119_v54, 2 }
 0x105   :  { %v121_v56 = vadd.f32 %v120_v55, %v119_v54 }
 0x107   :  { %v122_v57 = vrot.slane %v121_v56, 1 }
 0x109   :  { %v123_v58 = vadd.f32 %v122_v57, %v121_v56 }
 0x10b   :  { %144 = vpush %v123_v58 }
 0x13c   :  { %s145_s20 = spop %144 }
 0x13d   :  { %v125_v59 = vstv %s145_s20 }
 0x13e   :  { %127 = vst.msk [vmem:[#allocation3] sm:$0x1] %vm126_vm15, %v125_v59 }
 0x13f   :  { %138 = dma.vmem_to_hbm [thread:$0]  %s134_s16, 16, %s136_s19, [#allocation4]  }
 0x140   :  { %177 = dma.done.wait [#allocation4], 16  }
 0x141   :  { %178 = vsyncadd [#allocation4], 4294967280 }
 0x142   :  { %143 = vsyncpa [#allocation4], 1 }

</bundles_post_ra>
